<compile_context>
chip_gen: v7x
topology: tpu7x:2x2x1
jax: 0.10.0
libtpu: 0.0.40
codegen_flags: <defaults>
</compile_context>

<pallas_src>
import math
from collections import namedtuple

import jax
import jax.numpy as jnp
from jax.experimental import pallas as pl
from jax.experimental.pallas import tpu as pltpu


_INV_SQRT2 = 1.0 / math.sqrt(2.0)
_LANE = 128  # TPU lane width; all padded layer widths (test dims are <= 64)


def _leaky(x, slope=0.2):
    return jnp.where(x >= 0, x, slope * x)


def _dot(a, w):
    # f32 operands, f32 accumulation: single padded MXU pass at M=2, K<=128, N<=64.
    return jnp.dot(a, w, preferred_element_type=jnp.float32)


Plan = namedtuple(
    "Plan",
    [
        "blocks",        # tuple of (w1, b1, w2, b2, wsc_or_None) slab indices
        "w_sh", "b_sh",  # shared tail Linear
        "w_un", "b_un",  # packed per-domain head
        "num_domains", "style_dim",
    ],
)


# ----------------------------- fused kernel ---------------------------------


def build_fused_kernel(plan):
    """kernel(x_ref, w_ref, b_ref, y_ref, s_ref) — whole forward, gridless."""
    nd, sd = plan.num_domains, plan.style_dim

    def kernel(x_ref, w_ref, b_ref, y_ref, s_ref):
        biases = b_ref[...]            # [n_b_pad, 128] f32, loaded once
        h = x_ref[...]                 # [B, 128] f32 (zero padded beyond xvec_size)

        # ---- ResBlk stack (statically unrolled) ----
        for (w1, b1, w2, b2, wsc) in plan.blocks:
            r = _leaky(h)
            r = _dot(r, w_ref[w1]) + biases[b1:b1 + 1, :]
            r = _leaky(r)
            r = _dot(r, w_ref[w2]) + biases[b2:b2 + 1, :]
            sc = _dot(h, w_ref[wsc]) if wsc is not None else h
            h = (sc + r) * _INV_SQRT2

        # ---- shared tail: leaky -> Linear -> leaky ----
        h = _leaky(h)
        h = _dot(h, w_ref[plan.w_sh]) + biases[plan.b_sh:plan.b_sh + 1, :]
        h = _leaky(h)

        # ---- all domain heads in one matmul, then vectorized y-selection ----
        out_all = _dot(h, w_ref[plan.w_un]) + biases[plan.b_un:plan.b_un + 1, :]
        y_full = y_ref[...]            # [B, style_dim] int32 (row b == y[b])
        s = out_all[:, 0:sd]
        for d in range(1, nd):
            s = jnp.where(y_full == d, out_all[:, d * sd:(d + 1) * sd], s)
        s_ref[...] = s

    return kernel


# ----------------------------- packing --------------------------------------


def _pad2(a, rows, cols):
    a = a.astype(jnp.float32)
    assert a.shape[0] <= rows and a.shape[1] <= cols, a.shape
    return jnp.pad(a, ((0, rows - a.shape[0]), (0, cols - a.shape[1])))


def pack_params(params):
    """Pack every weight/bias into two contiguous, tile-padded VMEM slabs."""
    wmats, brows = [], []

    def add_w(w):
        wmats.append(_pad2(w, _LANE, _LANE))
        return len(wmats) - 1

    def add_b(b):
        brows.append(_pad2(b.reshape(1, -1), 1, _LANE))
        return len(brows) - 1

    blocks = []
    for blk in params["resblks"]:
        w1 = add_w(blk["w1"]); b1 = add_b(blk["b1"])
        w2 = add_w(blk["w2"]); b2 = add_b(blk["b2"])
        wsc = add_w(blk["wsc"]) if blk["wsc"] is not None else None
        blocks.append((w1, b1, w2, b2, wsc))

    w_sh = add_w(params["w_sh"]); b_sh = add_b(params["b_sh"])

    nd, _, sd = params["wu"].shape
    wu_flat = jnp.concatenate([params["wu"][d] for d in range(nd)], axis=1)   # [dim, nd*sd]
    bu_flat = jnp.concatenate([params["bu"][d] for d in range(nd)], axis=1)   # [1, nd*sd]
    w_un = add_w(wu_flat); b_un = add_b(bu_flat)

    wslab = jnp.stack(wmats)                                # [n_w, 128, 128] f32
    bmat = jnp.concatenate(brows, axis=0)                   # [n_b, 128] f32
    n_b_pad = ((bmat.shape[0] + 7) // 8) * 8
    bslab = jnp.pad(bmat, ((0, n_b_pad - bmat.shape[0]), (0, 0)))

    plan = Plan(tuple(blocks), w_sh, b_sh, w_un, b_un, nd, sd)
    return plan, wslab, bslab


# ----------------------------- forward wrapper -------------------------------


def style_encoder_forward(x, y, packed):
    plan, wslab, bslab = packed
    B, xdim = x.shape
    # TODO(synk): dims > 128 would need multi-lane-tile slab entries; the test
    # sizes (<= 64) fit a single lane tile.
    assert xdim <= _LANE, xdim

    # Lane-pad the input once (padding columns stay exactly zero through the net).
    x_pad = jnp.pad(x.astype(jnp.float32), ((0, 0), (0, _LANE - xdim)))
    # Broadcast domain ids so the in-kernel selection is a pure elementwise where.
    y_full = jnp.broadcast_to(y.astype(jnp.int32)[:, None], (B, plan.style_dim))

    kernel = build_fused_kernel(plan)
    vmem = pl.BlockSpec(memory_space=pltpu.MemorySpace.VMEM)
    return pl.pallas_call(
        kernel,
        out_shape=jax.ShapeDtypeStruct((B, plan.style_dim), jnp.float32),
        in_specs=[vmem, vmem, vmem, vmem],
        out_specs=vmem,
    )(x_pad, wslab, bslab, y_full)
    # TODO(synk): if deployment batch grows, add a batch grid axis with
    # weights-resident index_maps and dimension_semantics=("parallel",) so that
    # v7x's second TensorCore is used; a 2048-row f32 activation tile is ~1 MiB
    # and fits every generation's VMEM comfortably.


# ----------------------------- params / reference ----------------------------


def init_params(key, xvec_size, style_dim, num_domains):
    repeat_num = int(math.log2(xvec_size)) - 2
    params = {"resblks": []}
    dim_in = xvec_size
    dim_out = dim_in
    for _ in range(repeat_num):
        dim_out = max(dim_in // 2, style_dim)
        key, k1, k2, k3 = jax.random.split(key, 4)
        blk = {
            "w1": jax.random.normal(k1, (dim_in, dim_in), jnp.float32) / math.sqrt(dim_in),
            "b1": jnp.full((1, dim_in), 0.01, jnp.float32),
            "w2": jax.random.normal(k2, (dim_in, dim_out), jnp.float32) / math.sqrt(dim_in),
            "b2": jnp.full((1, dim_out), -0.01, jnp.float32),
            "wsc": (
                jax.random.normal(k3, (dim_in, dim_out), jnp.float32) / math.sqrt(dim_in)
                if dim_in != dim_out
                else None
            ),
        }
        params["resblks"].append(blk)
        dim_in = dim_out
    key, k4, k5 = jax.random.split(key, 3)
    params["w_sh"] = jax.random.normal(k4, (dim_out, dim_out), jnp.float32) / math.sqrt(dim_out)
    params["b_sh"] = jnp.full((1, dim_out), 0.02, jnp.float32)
    params["wu"] = jax.random.normal(
        k5, (num_domains, dim_out, style_dim), jnp.float32
    ) / math.sqrt(dim_out)
    params["bu"] = (
        0.01 * jnp.arange(num_domains * style_dim, dtype=jnp.float32)
    ).reshape(num_domains, 1, style_dim) / style_dim
    return params


def reference_forward(x, y, params):
    """Pure-JAX f32 replica of the PyTorch forward, for correctness checking."""
    h = x
    for blk in params["resblks"]:
        r = _leaky(h)
        r = r @ blk["w1"] + blk["b1"]
        r = _leaky(r)
        r = r @ blk["w2"] + blk["b2"]
        sc = h @ blk["wsc"] if blk["wsc"] is not None else h
        h = (sc + r) * _INV_SQRT2
    h = _leaky(h)
    h = h @ params["w_sh"] + params["b_sh"]
    h = _leaky(h)
    outs = jnp.stack(
        [h @ params["wu"][d] + params["bu"][d, 0] for d in range(params["wu"].shape[0])],
        axis=1,
    )  # [B, num_domains, style_dim]
    return outs[jnp.arange(x.shape[0]), y]


# ----------------------------- main ------------------------------------------


if __name__ == "__main__":
    # xvec_size=64, style_dim=32, num_domains=2 -> repeat_num = log2(64) - 2 = 4 ResBlks:
    #   (64->32 learned shortcut), then three (32->32 identity shortcut).
    B, XVEC, STYLE, NDOM = 2, 64, 32, 2

    root = jax.random.PRNGKey(0)
    kx, ky, kp = jax.random.split(root, 3)
    x = jax.random.normal(kx, (B, XVEC), jnp.float32)
    y = jax.random.randint(ky, (B,), 0, NDOM, jnp.int32)
    params = init_params(kp, XVEC, STYLE, NDOM)
    packed = pack_params(params)

    s = style_encoder_forward(x, y, packed)
    s = jax.block_until_ready(s)

    s_ref = reference_forward(x, y, params)
    assert s.shape == (B, STYLE), s.shape
    max_err = float(jnp.max(jnp.abs(s - s_ref)))
    assert jnp.allclose(s, s_ref, rtol=1e-2, atol=1e-2), max_err

    print("KERNEL_OK")
</pallas_src>

<mosaic_0001>
module attributes {stable_mosaic.version = 11 : i64} {
  func.func @kernel(%arg0: memref<2x128xf32, #tpu.memory_space<vmem>>, %arg1: memref<11x128x128xf32, #tpu.memory_space<vmem>>, %arg2: memref<16x128xf32, #tpu.memory_space<vmem>>, %arg3: memref<2x32xi32, #tpu.memory_space<vmem>>, %arg4: memref<2x32xf32, #tpu.memory_space<vmem>>) attributes {dimension_semantics = [], scalar_prefetch = 0 : i64, scratch_operands = 0 : i64, tpu.core_type = #tpu.core_type<tc>} {
    %c0 = arith.constant 0 : index
    %c0_0 = arith.constant 0 : index
    %0 = vector.load %arg2[%c0, %c0_0] : memref<16x128xf32, #tpu.memory_space<vmem>>, vector<16x128xf32>
    %c0_1 = arith.constant 0 : index
    %c0_2 = arith.constant 0 : index
    %1 = vector.load %arg0[%c0_1, %c0_2] : memref<2x128xf32, #tpu.memory_space<vmem>>, vector<2x128xf32>
    %cst = arith.constant 0.000000e+00 : f32
    %2 = vector.broadcast %cst : f32 to vector<2x128xf32>
    %3 = arith.cmpf oge, %1, %2 : vector<2x128xf32>
    %cst_3 = arith.constant 2.000000e-01 : f32
    %4 = vector.broadcast %cst_3 : f32 to vector<2x128xf32>
    %5 = arith.mulf %4, %1 : vector<2x128xf32>
    %6 = arith.select %3, %1, %5 : vector<2x128xi1>, vector<2x128xf32>
    %c0_4 = arith.constant 0 : index
    %c0_5 = arith.constant 0 : index
    %c0_6 = arith.constant 0 : index
    %7 = vector.load %arg1[%c0_4, %c0_5, %c0_6] : memref<11x128x128xf32, #tpu.memory_space<vmem>>, vector<1x128x128xf32>
    %8 = vector.shape_cast %7 : vector<1x128x128xf32> to vector<128x128xf32>
    %cst_7 = arith.constant dense<0.000000e+00> : vector<2x128xf32>
    %9 = tpu.matmul %6, %8, %cst_7 {dimension_numbers = #tpu.dot_dimension_numbers<[1], [0], [0], [1], [0, 0, 1, 1], [], []>} : vector<2x128xf32>, vector<128x128xf32>, vector<2x128xf32> -> vector<2x128xf32>
    %10 = vector.extract_strided_slice %0 {offsets = [0, 0], sizes = [1, 128], strides = [1, 1]} : vector<16x128xf32> to vector<1x128xf32>
    %11 = vector.broadcast %10 : vector<1x128xf32> to vector<2x128xf32>
    %12 = arith.addf %9, %11 : vector<2x128xf32>
    %cst_8 = arith.constant 0.000000e+00 : f32
    %13 = vector.broadcast %cst_8 : f32 to vector<2x128xf32>
    %14 = arith.cmpf oge, %12, %13 : vector<2x128xf32>
    %cst_9 = arith.constant 2.000000e-01 : f32
    %15 = vector.broadcast %cst_9 : f32 to vector<2x128xf32>
    %16 = arith.mulf %15, %12 : vector<2x128xf32>
    %17 = arith.select %14, %12, %16 : vector<2x128xi1>, vector<2x128xf32>
    %c1 = arith.constant 1 : index
    %c0_10 = arith.constant 0 : index
    %c0_11 = arith.constant 0 : index
    %18 = vector.load %arg1[%c1, %c0_10, %c0_11] : memref<11x128x128xf32, #tpu.memory_space<vmem>>, vector<1x128x128xf32>
    %19 = vector.shape_cast %18 : vector<1x128x128xf32> to vector<128x128xf32>
    %cst_12 = arith.constant dense<0.000000e+00> : vector<2x128xf32>
    %20 = tpu.matmul %17, %19, %cst_12 {dimension_numbers = #tpu.dot_dimension_numbers<[1], [0], [0], [1], [0, 0, 1, 1], [], []>} : vector<2x128xf32>, vector<128x128xf32>, vector<2x128xf32> -> vector<2x128xf32>
    %21 = vector.extract_strided_slice %0 {offsets = [1, 0], sizes = [1, 128], strides = [1, 1]} : vector<16x128xf32> to vector<1x128xf32>
    %22 = vector.broadcast %21 : vector<1x128xf32> to vector<2x128xf32>
    %23 = arith.addf %20, %22 : vector<2x128xf32>
    %c2 = arith.constant 2 : index
    %c0_13 = arith.constant 0 : index
    %c0_14 = arith.constant 0 : index
    %24 = vector.load %arg1[%c2, %c0_13, %c0_14] : memref<11x128x128xf32, #tpu.memory_space<vmem>>, vector<1x128x128xf32>
    %25 = vector.shape_cast %24 : vector<1x128x128xf32> to vector<128x128xf32>
    %cst_15 = arith.constant dense<0.000000e+00> : vector<2x128xf32>
    %26 = tpu.matmul %1, %25, %cst_15 {dimension_numbers = #tpu.dot_dimension_numbers<[1], [0], [0], [1], [0, 0, 1, 1], [], []>} : vector<2x128xf32>, vector<128x128xf32>, vector<2x128xf32> -> vector<2x128xf32>
    %27 = arith.addf %26, %23 : vector<2x128xf32>
    %cst_16 = arith.constant 0.707106769 : f32
    %28 = vector.broadcast %cst_16 : f32 to vector<2x128xf32>
    %29 = arith.mulf %27, %28 : vector<2x128xf32>
    %cst_17 = arith.constant 0.000000e+00 : f32
    %30 = vector.broadcast %cst_17 : f32 to vector<2x128xf32>
    %31 = arith.cmpf oge, %29, %30 : vector<2x128xf32>
    %cst_18 = arith.constant 2.000000e-01 : f32
    %32 = vector.broadcast %cst_18 : f32 to vector<2x128xf32>
    %33 = arith.mulf %32, %29 : vector<2x128xf32>
    %34 = arith.select %31, %29, %33 : vector<2x128xi1>, vector<2x128xf32>
    %c3 = arith.constant 3 : index
    %c0_19 = arith.constant 0 : index
    %c0_20 = arith.constant 0 : index
    %35 = vector.load %arg1[%c3, %c0_19, %c0_20] : memref<11x128x128xf32, #tpu.memory_space<vmem>>, vector<1x128x128xf32>
    %36 = vector.shape_cast %35 : vector<1x128x128xf32> to vector<128x128xf32>
    %cst_21 = arith.constant dense<0.000000e+00> : vector<2x128xf32>
    %37 = tpu.matmul %34, %36, %cst_21 {dimension_numbers = #tpu.dot_dimension_numbers<[1], [0], [0], [1], [0, 0, 1, 1], [], []>} : vector<2x128xf32>, vector<128x128xf32>, vector<2x128xf32> -> vector<2x128xf32>
    %38 = vector.extract_strided_slice %0 {offsets = [2, 0], sizes = [1, 128], strides = [1, 1]} : vector<16x128xf32> to vector<1x128xf32>
    %39 = vector.broadcast %38 : vector<1x128xf32> to vector<2x128xf32>
    %40 = arith.addf %37, %39 : vector<2x128xf32>
    %cst_22 = arith.constant 0.000000e+00 : f32
    %41 = vector.broadcast %cst_22 : f32 to vector<2x128xf32>
    %42 = arith.cmpf oge, %40, %41 : vector<2x128xf32>
    %cst_23 = arith.constant 2.000000e-01 : f32
    %43 = vector.broadcast %cst_23 : f32 to vector<2x128xf32>
    %44 = arith.mulf %43, %40 : vector<2x128xf32>
    %45 = arith.select %42, %40, %44 : vector<2x128xi1>, vector<2x128xf32>
    %c4 = arith.constant 4 : index
    %c0_24 = arith.constant 0 : index
    %c0_25 = arith.constant 0 : index
    %46 = vector.load %arg1[%c4, %c0_24, %c0_25] : memref<11x128x128xf32, #tpu.memory_space<vmem>>, vector<1x128x128xf32>
    %47 = vector.shape_cast %46 : vector<1x128x128xf32> to vector<128x128xf32>
    %cst_26 = arith.constant dense<0.000000e+00> : vector<2x128xf32>
    %48 = tpu.matmul %45, %47, %cst_26 {dimension_numbers = #tpu.dot_dimension_numbers<[1], [0], [0], [1], [0, 0, 1, 1], [], []>} : vector<2x128xf32>, vector<128x128xf32>, vector<2x128xf32> -> vector<2x128xf32>
    %49 = vector.extract_strided_slice %0 {offsets = [3, 0], sizes = [1, 128], strides = [1, 1]} : vector<16x128xf32> to vector<1x128xf32>
    %50 = vector.broadcast %49 : vector<1x128xf32> to vector<2x128xf32>
    %51 = arith.addf %48, %50 : vector<2x128xf32>
    %52 = arith.addf %29, %51 : vector<2x128xf32>
    %cst_27 = arith.constant 0.707106769 : f32
    %53 = vector.broadcast %cst_27 : f32 to vector<2x128xf32>
    %54 = arith.mulf %52, %53 : vector<2x128xf32>
    %cst_28 = arith.constant 0.000000e+00 : f32
    %55 = vector.broadcast %cst_28 : f32 to vector<2x128xf32>
    %56 = arith.cmpf oge, %54, %55 : vector<2x128xf32>
    %cst_29 = arith.constant 2.000000e-01 : f32
    %57 = vector.broadcast %cst_29 : f32 to vector<2x128xf32>
    %58 = arith.mulf %57, %54 : vector<2x128xf32>
    %59 = arith.select %56, %54, %58 : vector<2x128xi1>, vector<2x128xf32>
    %c5 = arith.constant 5 : index
    %c0_30 = arith.constant 0 : index
    %c0_31 = arith.constant 0 : index
    %60 = vector.load %arg1[%c5, %c0_30, %c0_31] : memref<11x128x128xf32, #tpu.memory_space<vmem>>, vector<1x128x128xf32>
    %61 = vector.shape_cast %60 : vector<1x128x128xf32> to vector<128x128xf32>
    %cst_32 = arith.constant dense<0.000000e+00> : vector<2x128xf32>
    %62 = tpu.matmul %59, %61, %cst_32 {dimension_numbers = #tpu.dot_dimension_numbers<[1], [0], [0], [1], [0, 0, 1, 1], [], []>} : vector<2x128xf32>, vector<128x128xf32>, vector<2x128xf32> -> vector<2x128xf32>
    %63 = vector.extract_strided_slice %0 {offsets = [4, 0], sizes = [1, 128], strides = [1, 1]} : vector<16x128xf32> to vector<1x128xf32>
    %64 = vector.broadcast %63 : vector<1x128xf32> to vector<2x128xf32>
    %65 = arith.addf %62, %64 : vector<2x128xf32>
    %cst_33 = arith.constant 0.000000e+00 : f32
    %66 = vector.broadcast %cst_33 : f32 to vector<2x128xf32>
    %67 = arith.cmpf oge, %65, %66 : vector<2x128xf32>
    %cst_34 = arith.constant 2.000000e-01 : f32
    %68 = vector.broadcast %cst_34 : f32 to vector<2x128xf32>
    %69 = arith.mulf %68, %65 : vector<2x128xf32>
    %70 = arith.select %67, %65, %69 : vector<2x128xi1>, vector<2x128xf32>
    %c6 = arith.constant 6 : index
    %c0_35 = arith.constant 0 : index
    %c0_36 = arith.constant 0 : index
    %71 = vector.load %arg1[%c6, %c0_35, %c0_36] : memref<11x128x128xf32, #tpu.memory_space<vmem>>, vector<1x128x128xf32>
    %72 = vector.shape_cast %71 : vector<1x128x128xf32> to vector<128x128xf32>
    %cst_37 = arith.constant dense<0.000000e+00> : vector<2x128xf32>
    %73 = tpu.matmul %70, %72, %cst_37 {dimension_numbers = #tpu.dot_dimension_numbers<[1], [0], [0], [1], [0, 0, 1, 1], [], []>} : vector<2x128xf32>, vector<128x128xf32>, vector<2x128xf32> -> vector<2x128xf32>
    %74 = vector.extract_strided_slice %0 {offsets = [5, 0], sizes = [1, 128], strides = [1, 1]} : vector<16x128xf32> to vector<1x128xf32>
    %75 = vector.broadcast %74 : vector<1x128xf32> to vector<2x128xf32>
    %76 = arith.addf %73, %75 : vector<2x128xf32>
    %77 = arith.addf %54, %76 : vector<2x128xf32>
    %cst_38 = arith.constant 0.707106769 : f32
    %78 = vector.broadcast %cst_38 : f32 to vector<2x128xf32>
    %79 = arith.mulf %77, %78 : vector<2x128xf32>
    %cst_39 = arith.constant 0.000000e+00 : f32
    %80 = vector.broadcast %cst_39 : f32 to vector<2x128xf32>
    %81 = arith.cmpf oge, %79, %80 : vector<2x128xf32>
    %cst_40 = arith.constant 2.000000e-01 : f32
    %82 = vector.broadcast %cst_40 : f32 to vector<2x128xf32>
    %83 = arith.mulf %82, %79 : vector<2x128xf32>
    %84 = arith.select %81, %79, %83 : vector<2x128xi1>, vector<2x128xf32>
    %c7 = arith.constant 7 : index
    %c0_41 = arith.constant 0 : index
    %c0_42 = arith.constant 0 : index
    %85 = vector.load %arg1[%c7, %c0_41, %c0_42] : memref<11x128x128xf32, #tpu.memory_space<vmem>>, vector<1x128x128xf32>
    %86 = vector.shape_cast %85 : vector<1x128x128xf32> to vector<128x128xf32>
    %cst_43 = arith.constant dense<0.000000e+00> : vector<2x128xf32>
    %87 = tpu.matmul %84, %86, %cst_43 {dimension_numbers = #tpu.dot_dimension_numbers<[1], [0], [0], [1], [0, 0, 1, 1], [], []>} : vector<2x128xf32>, vector<128x128xf32>, vector<2x128xf32> -> vector<2x128xf32>
    %88 = vector.extract_strided_slice %0 {offsets = [6, 0], sizes = [1, 128], strides = [1, 1]} : vector<16x128xf32> to vector<1x128xf32>
    %89 = vector.broadcast %88 : vector<1x128xf32> to vector<2x128xf32>
    %90 = arith.addf %87, %89 : vector<2x128xf32>
    %cst_44 = arith.constant 0.000000e+00 : f32
    %91 = vector.broadcast %cst_44 : f32 to vector<2x128xf32>
    %92 = arith.cmpf oge, %90, %91 : vector<2x128xf32>
    %cst_45 = arith.constant 2.000000e-01 : f32
    %93 = vector.broadcast %cst_45 : f32 to vector<2x128xf32>
    %94 = arith.mulf %93, %90 : vector<2x128xf32>
    %95 = arith.select %92, %90, %94 : vector<2x128xi1>, vector<2x128xf32>
    %c8 = arith.constant 8 : index
    %c0_46 = arith.constant 0 : index
    %c0_47 = arith.constant 0 : index
    %96 = vector.load %arg1[%c8, %c0_46, %c0_47] : memref<11x128x128xf32, #tpu.memory_space<vmem>>, vector<1x128x128xf32>
    %97 = vector.shape_cast %96 : vector<1x128x128xf32> to vector<128x128xf32>
    %cst_48 = arith.constant dense<0.000000e+00> : vector<2x128xf32>
    %98 = tpu.matmul %95, %97, %cst_48 {dimension_numbers = #tpu.dot_dimension_numbers<[1], [0], [0], [1], [0, 0, 1, 1], [], []>} : vector<2x128xf32>, vector<128x128xf32>, vector<2x128xf32> -> vector<2x128xf32>
    %99 = vector.extract_strided_slice %0 {offsets = [7, 0], sizes = [1, 128], strides = [1, 1]} : vector<16x128xf32> to vector<1x128xf32>
    %100 = vector.broadcast %99 : vector<1x128xf32> to vector<2x128xf32>
    %101 = arith.addf %98, %100 : vector<2x128xf32>
    %102 = arith.addf %79, %101 : vector<2x128xf32>
    %cst_49 = arith.constant 0.707106769 : f32
    %103 = vector.broadcast %cst_49 : f32 to vector<2x128xf32>
    %104 = arith.mulf %102, %103 : vector<2x128xf32>
    %cst_50 = arith.constant 0.000000e+00 : f32
    %105 = vector.broadcast %cst_50 : f32 to vector<2x128xf32>
    %106 = arith.cmpf oge, %104, %105 : vector<2x128xf32>
    %cst_51 = arith.constant 2.000000e-01 : f32
    %107 = vector.broadcast %cst_51 : f32 to vector<2x128xf32>
    %108 = arith.mulf %107, %104 : vector<2x128xf32>
    %109 = arith.select %106, %104, %108 : vector<2x128xi1>, vector<2x128xf32>
    %c9 = arith.constant 9 : index
    %c0_52 = arith.constant 0 : index
    %c0_53 = arith.constant 0 : index
    %110 = vector.load %arg1[%c9, %c0_52, %c0_53] : memref<11x128x128xf32, #tpu.memory_space<vmem>>, vector<1x128x128xf32>
    %111 = vector.shape_cast %110 : vector<1x128x128xf32> to vector<128x128xf32>
    %cst_54 = arith.constant dense<0.000000e+00> : vector<2x128xf32>
    %112 = tpu.matmul %109, %111, %cst_54 {dimension_numbers = #tpu.dot_dimension_numbers<[1], [0], [0], [1], [0, 0, 1, 1], [], []>} : vector<2x128xf32>, vector<128x128xf32>, vector<2x128xf32> -> vector<2x128xf32>
    %113 = vector.extract_strided_slice %0 {offsets = [8, 0], sizes = [1, 128], strides = [1, 1]} : vector<16x128xf32> to vector<1x128xf32>
    %114 = vector.broadcast %113 : vector<1x128xf32> to vector<2x128xf32>
    %115 = arith.addf %112, %114 : vector<2x128xf32>
    %cst_55 = arith.constant 0.000000e+00 : f32
    %116 = vector.broadcast %cst_55 : f32 to vector<2x128xf32>
    %117 = arith.cmpf oge, %115, %116 : vector<2x128xf32>
    %cst_56 = arith.constant 2.000000e-01 : f32
    %118 = vector.broadcast %cst_56 : f32 to vector<2x128xf32>
    %119 = arith.mulf %118, %115 : vector<2x128xf32>
    %120 = arith.select %117, %115, %119 : vector<2x128xi1>, vector<2x128xf32>
    %c10 = arith.constant 10 : index
    %c0_57 = arith.constant 0 : index
    %c0_58 = arith.constant 0 : index
    %121 = vector.load %arg1[%c10, %c0_57, %c0_58] : memref<11x128x128xf32, #tpu.memory_space<vmem>>, vector<1x128x128xf32>
    %122 = vector.shape_cast %121 : vector<1x128x128xf32> to vector<128x128xf32>
    %cst_59 = arith.constant dense<0.000000e+00> : vector<2x128xf32>
    %123 = tpu.matmul %120, %122, %cst_59 {dimension_numbers = #tpu.dot_dimension_numbers<[1], [0], [0], [1], [0, 0, 1, 1], [], []>} : vector<2x128xf32>, vector<128x128xf32>, vector<2x128xf32> -> vector<2x128xf32>
    %124 = vector.extract_strided_slice %0 {offsets = [9, 0], sizes = [1, 128], strides = [1, 1]} : vector<16x128xf32> to vector<1x128xf32>
    %125 = vector.broadcast %124 : vector<1x128xf32> to vector<2x128xf32>
    %126 = arith.addf %123, %125 : vector<2x128xf32>
    %c0_60 = arith.constant 0 : index
    %c0_61 = arith.constant 0 : index
    %127 = vector.load %arg3[%c0_60, %c0_61] : memref<2x32xi32, #tpu.memory_space<vmem>>, vector<2x32xi32>
    %128 = vector.extract_strided_slice %126 {offsets = [0, 0], sizes = [2, 32], strides = [1, 1]} : vector<2x128xf32> to vector<2x32xf32>
    %c1_i32 = arith.constant 1 : i32
    %129 = vector.broadcast %c1_i32 : i32 to vector<2x32xi32>
    %130 = arith.cmpi eq, %127, %129 : vector<2x32xi32>
    %131 = vector.extract_strided_slice %126 {offsets = [0, 32], sizes = [2, 32], strides = [1, 1]} : vector<2x128xf32> to vector<2x32xf32>
    %132 = arith.select %130, %131, %128 : vector<2x32xi1>, vector<2x32xf32>
    %c0_62 = arith.constant 0 : index
    %c0_63 = arith.constant 0 : index
    %133 = vector.load %arg4[%c0_62, %c0_63] : memref<2x32xf32, #tpu.memory_space<vmem>>, vector<2x32xf32>
    tpu.vector_store %arg4[%c0_62, %c0_63], %132 {strides = array<i32>} : memref<2x32xf32, #tpu.memory_space<vmem>>, vector<2x32xf32>,
    return
  }
}

</mosaic_0001>

<bundles_post_ra>
// kernel: tpu_custom_call.1
= control target key start
LH: loop header
LB: loop body
LE: loop exit
PB: predicated region body
PF: predicated region fallthrough
CT: control target
= control target key end

     0   :  { %9 = vsyncpa [#allocation3], 0  ;;  %s2315_s0 = inlined_call_operand.hbm [shape: f32[2,128], index: 0, kind: input, shape index: {}]   ;;  %s2316_s1 = inlined_call_operand.hbm [shape: f32[11,128,128], index: 1, kind: input, shape index: {}]   ;;  %s2317_s2 = inlined_call_operand.hbm [shape: f32[16,128], index: 2, kind: input, shape index: {}]   ;;  %s2318_s3 = inlined_call_operand.vmem [shape: s32[2,32], index: 3, kind: input, shape index: {}]   ;;  %s2319_s4 = inlined_call_operand.hbm [shape: f32[2,32], index: 4, kind: output, shape index: {}]  }
   0x1   :  { %10 = vsyncpa [#allocation6], 0 }
   0x2   :  { %11 = vsyncpa [#allocation4], 0  ;;  %s2061_s15 = smov [#allocation5]   ;;  %s1967_s19 = scalar_lea.hbm %s2316_s1, 22528 }
   0x3   :  { %s27_s16 = sshll.u32 %s2061_s15, 4  ;;  %p1968_p0 = scmp.ne.s32.totalorder %s2316_s1, %s1967_s19  ;;  %s28_s16 = int_to_ptr.vmem [resolvable:$true] %s27_s16 }
   0x4   :  { %p1971_p1 = scmp.lt.u32.totalorder %s1967_s19, %s2316_s1 }
   0x6   :  { %p1973_p2 = pnand %p1971_p1, %p1968_p0 }
   0x8   :  { %1976 = shalt.err (!%p1973_p2)
}
   0x9   :  { %s1977_s24 = scalar_lea.vmem %s28_s16, 22528  ;;  %p1982_p4 = scmp.lt.s32.totalorder %s28_s16, %s28_s16 }
   0xa   :  { %p1978_p3 = scmp.ne.s32.totalorder %s28_s16, %s1977_s24  ;;  %p1983_p5 = scmp.lt.s32.totalorder %s1977_s24, %s1977_s24 }
   0xc   :  { %p1984_p6 = por %p1983_p5, %p1982_p4 }
   0xe   :  { %p1985_p7 = pnand %p1984_p6, %p1978_p3 }
  0x10   :  { %1988 = shalt.err (!%p1985_p7)
}
  0x11   :  { %s2062_s25 = smov 128   ;;  %s2063_s26 = smov 8  }
  0x12   :  { %33 = dma.hbm_to_vmem [thread:$0]  %s2316_s1, 22528, %s28_s16, [#allocation6], %s2062_s25, %s2062_s25, %s2063_s26  }
  0x13   :  { %s2064_s29 = smov [#allocation2]   ;;  %s2065_s5 = smov [#allocation7]  }
  0x14   :  { %s18_s30 = sshll.u32 %s2064_s29, 4  ;;  %s39_s6 = sshll.u32 %s2065_s5, 4  ;;  %s19_s30 = int_to_ptr.vmem [resolvable:$true] %s18_s30  ;;  %s40_s6 = int_to_ptr.vmem [resolvable:$true] %s39_s6 }
  0x15   :  { %s1989_s9 = scalar_lea.hbm %s2315_s0, 32 }
  0x16   :  { %p1990_p8 = scmp.ne.s32.totalorder %s2315_s0, %s1989_s9  ;;  %p1993_p9 = scmp.lt.u32.totalorder %s1989_s9, %s2315_s0 }
  0x18   :  { %p1995_p10 = pnand %p1993_p9, %p1990_p8 }
  0x1a   :  { %1998 = shalt.err (!%p1995_p10)
}
  0x1b   :  { %s1999_s1 = scalar_lea.vmem %s19_s30, 32  ;;  %p2004_p12 = scmp.lt.s32.totalorder %s19_s30, %s19_s30 }
  0x1c   :  { %p2000_p11 = scmp.ne.s32.totalorder %s19_s30, %s1999_s1  ;;  %p2005_p13 = scmp.lt.s32.totalorder %s1999_s1, %s1999_s1 }
  0x1e   :  { %p2006_p0 = por %p2005_p13, %p2004_p12 }
  0x20   :  { %p2007_p1 = pnand %p2006_p0, %p2000_p11 }
  0x22   :  { %2010 = shalt.err (!%p2007_p1)
}
  0x23   :  { %21 = dma.hbm_to_vmem [thread:$0]  %s2315_s0, 32, %s19_s30, [#allocation3]  }
  0x24   :  { %s2011_s18 = scalar_lea.hbm %s2317_s2, 256 }
  0x25   :  { %p2012_p2 = scmp.ne.s32.totalorder %s2317_s2, %s2011_s18  ;;  %p2015_p3 = scmp.lt.u32.totalorder %s2011_s18, %s2317_s2 }
  0x27   :  { %p2017_p4 = pnand %p2015_p3, %p2012_p2 }
  0x29   :  { %2020 = shalt.err (!%p2017_p4)
}
  0x2a   :  { %s2021_s23 = scalar_lea.vmem %s40_s6, 256  ;;  %p2026_p6 = scmp.lt.s32.totalorder %s40_s6, %s40_s6 }
  0x2b   :  { %p2022_p5 = scmp.ne.s32.totalorder %s40_s6, %s2021_s23  ;;  %p2027_p7 = scmp.lt.s32.totalorder %s2021_s23, %s2021_s23 }
  0x2d   :  { %p2028_p8 = por %p2027_p7, %p2026_p6 }
  0x2f   :  { %p2029_p9 = pnand %p2028_p8, %p2022_p5 }
  0x31   :  { %2032 = shalt.err (!%p2029_p9)
}
  0x32   :  { %45 = dma.hbm_to_vmem [thread:$0]  %s2317_s2, 256, %s40_s6, [#allocation6], %s2062_s25, %s2062_s25, %s2063_s26  }
  0x33   :  { %2055 = dma.done.wait [#allocation3], 32  }
  0x34   :  { %2056 = vsyncadd [#allocation3], 4294967264 }
  0x35   :  { %2057 = dma.done.wait [#allocation6], 22784  }
  0x36   :  { %2058 = vsyncadd [#allocation6], 4294944512  ;;  %v2066_v0 = vmov 0.0|0.0   ;;  %vm2067_vm0 = vmmov 0   ;;  %v2068_v1 = vmov 0.0   ;;  %v63_v2 = vld [vmem:[#allocation5] sm:$0xff] }
  0x37   :  { %1690 = vmatprep.subr.bf16.mxu0 %v2066_v0  ;;  %1337 = vmatprep.mubr.msk.f32.mxu0 %vm2067_vm0, %v2068_v1  ;;  %v64_v3 = vld [vmem:[#allocation5 + $0x8] sm:$0xff]  ;;  %v65_v4 = vld [vmem:[#allocation5 + $0x10] sm:$0xff]  ;;  %v66_v6 = vld [vmem:[#allocation5 + $0x18] sm:$0xff]  ;;  %s2069_s2 = smov 96   ;;  %s2070_s27 = smov [#allocation8]   ;;  %vm1100_vm12 = vcmask 254976  }
  0x38   :  { %1714 = vmatprep.subr.bf16.mxu1 %v2066_v0  ;;  %1372 = vmatprep.mubr.msk.f32.mxu1 %vm2067_vm0, %v2068_v1  ;;  %v1691_v5 = vpack.c.bf16 %v64_v3, %v63_v2  ;;  %v1694_v7 = vpack.c.bf16 %v66_v6, %v65_v4  ;;  %v67_v8 = vld [vmem:[#allocation5 + $0x20] sm:$0xff]  ;;  %v68_v9 = vld [vmem:[#allocation5 + $0x28] sm:$0xff]  ;;  %v159_v12 = vld [vmem:[#allocation5 + $0x90] sm:$0xff]  ;;  %s1108_s28 = sshll.u32 %s2070_s27, 4  ;;  %s1109_s28 = int_to_ptr.vmem [resolvable:$true] %s1108_s28 }
  0x39   :  { %v157_v10 = vld [vmem:[#allocation5 + $0x80] sm:$0xff]  ;;  %v158_v11 = vld [vmem:[#allocation5 + $0x88] sm:$0xff]  ;;  %v160_v13 = vld [vmem:[#allocation5 + $0x98] sm:$0xff]  ;;  %v1697_v14 = vpack.c.bf16 %v68_v9, %v67_v8  ;;  %v79_v9 = vlaneseq  ;;  %s2033_s29 = scalar_lea.vmem %s1109_s28, 32  ;;  %p2038_p11 = scmp.lt.s32.totalorder %s1109_s28, %s1109_s28 }
  0x3a   :  { %1692 = vmatpush3.bf16.msra.mxu0 %v1691_v5  ;;  %v1715_v15 = vpack.c.bf16 %v158_v11, %v157_v10  ;;  %v69_v16 = vld [vmem:[#allocation5 + $0x30] sm:$0xff]  ;;  %v70_v17 = vld [vmem:[#allocation5 + $0x38] sm:$0xff]  ;;  %v1718_v18 = vpack.c.bf16 %v160_v13, %v159_v12  ;;  %v161_v19 = vld [vmem:[#allocation5 + $0xa0] sm:$0xff]  ;;  %p2034_p10 = scmp.ne.s32.totalorder %s1109_s28, %s2033_s29  ;;  %p2039_p12 = scmp.lt.s32.totalorder %s2033_s29, %s2033_s29 }
  0x3b   :  { %1693 = vmatprep.subr.bf16.mxu0 %v2066_v0  ;;  %v162_v20 = vld [vmem:[#allocation5 + $0xa8] sm:$0xff]  ;;  %v1700_v21 = vpack.c.bf16 %v70_v17, %v69_v16  ;;  %v71_v22 = vld [vmem:[#allocation5 + $0x40] sm:$0xff]  ;;  %v163_v25 = vld [vmem:[#allocation5 + $0xb0] sm:$0xff]  ;;  %v2173_v10 = vshrl.u32 %v79_v9, 7 }
  0x3c   :  { %1716 = vmatpush3.bf16.msra.mxu1 %v1715_v15  ;;  %v72_v23 = vld [vmem:[#allocation5 + $0x48] sm:$0xff]  ;;  %v1721_v24 = vpack.c.bf16 %v162_v20, %v161_v19  ;;  %v164_v26 = vld [vmem:[#allocation5 + $0xb8] sm:$0xff]  ;;  %v73_v28 = vld [vmem:[#allocation5 + $0x50] sm:$0xff]  ;;  %p2040_p13 = por %p2039_p12, %p2038_p11 }
  0x3d   :  { %1717 = vmatprep.subr.bf16.mxu1 %v2066_v0  ;;  %v1703_v27 = vpack.c.bf16 %v72_v23, %v71_v22  ;;  %v74_v29 = vld [vmem:[#allocation5 + $0x58] sm:$0xff]  ;;  %v1724_v30 = vpack.c.bf16 %v164_v26, %v163_v25  ;;  %v165_v31 = vld [vmem:[#allocation5 + $0xc0] sm:$0xff]  ;;  %v166_v32 = vld [vmem:[#allocation5 + $0xc8] sm:$0xff]  ;;  %v81_v11 = vsub.s32 0, %v2173_v10 }
  0x3e   :  { %1695 = vmatpush3.bf16.msra.mxu0 %v1694_v7  ;;  %v1706_v33 = vpack.c.bf16 %v74_v29, %v73_v28  ;;  %v75_v34 = vld [vmem:[#allocation5 + $0x60] sm:$0xff]  ;;  %v76_v35 = vld [vmem:[#allocation5 + $0x68] sm:$0xff]  ;;  %v1727_v36 = vpack.c.bf16 %v166_v32, %v165_v31  ;;  %v167_v37 = vld [vmem:[#allocation5 + $0xd0] sm:$0xff]  ;;  %p2041_p0 = pnand %p2040_p13, %p2034_p10 }
  0x3f   :  { %1696 = vmatprep.subr.bf16.mxu0 %v2066_v0  ;;  %v168_v38 = vld [vmem:[#allocation5 + $0xd8] sm:$0xff]  ;;  %v1709_v39 = vpack.c.bf16 %v76_v35, %v75_v34  ;;  %v77_v40 = vld [vmem:[#allocation5 + $0x70] sm:$0xff]  ;;  %v169_v44 = vld [vmem:[#allocation5 + $0xe0] sm:$0xff] }
  0x40   :  { %1719 = vmatpush3.bf16.msra.mxu1 %v1718_v18  ;;  %v78_v41 = vld [vmem:[#allocation5 + $0x78] sm:$0xff]  ;;  %v1730_v43 = vpack.c.bf16 %v168_v38, %v167_v37  ;;  %v170_v45 = vld [vmem:[#allocation5 + $0xe8] sm:$0xff]  ;;  %v171_v50 = vld [vmem:[#allocation5 + $0xf0] sm:$0xff] }
  0x41   :  { %1720 = vmatprep.subr.bf16.mxu1 %v2066_v0  ;;  %v2154_v42 = vld [vmem:[#allocation2] sm:$0x3]  ;;  %v1712_v46 = vpack.c.bf16 %v78_v41, %v77_v40  ;;  %v1733_v48 = vpack.c.bf16 %v170_v45, %v169_v44  ;;  %v339_v53 = vld [vmem:[#allocation5 + $0x180] sm:$0xff]  ;;  %v340_v54 = vld [vmem:[#allocation5 + $0x188] sm:$0xff] }
  0x42   :  { %1698 = vmatpush3.bf16.msra.mxu0 %v1697_v14  ;;  %v61_v47 = vmul.f32 0.2, %v2154_v42  ;;  %vm60_vm1 = vcmp.ge.f32.partialorder %v2154_v42, 0.0  ;;  %v172_v51 = vld [vmem:[#allocation5 + $0xf8] sm:$0xff]  ;;  %v341_v55 = vld [vmem:[#allocation5 + $0x190] sm:$0xff]  ;;  %v1763_v56 = vpack.c.bf16 %v340_v54, %v339_v53  ;;  %v343_v59 = vld [vmem:[#allocation5 + $0x1a0] sm:$0xff] }
  0x43   :  { %1699 = vmatprep.subr.bf16.mxu0 %v2066_v0  ;;  %v1736_v52 = vpack.c.bf16 %v172_v51, %v171_v50  ;;  %v342_v57 = vld [vmem:[#allocation5 + $0x198] sm:$0xff]  ;;  %v344_v60 = vld [vmem:[#allocation5 + $0x1a8] sm:$0xff]  ;;  %v345_v62 = vld [vmem:[#allocation5 + $0x1b0] sm:$0xff]  ;;  %v175_v50 = vsub.s32 1, %v2173_v10 }
  0x44   :  { %1722 = vmatpush3.bf16.msra.mxu1 %v1721_v24  ;;  %v62_v49 = vsel %vm60_vm1, %v2154_v42, %v61_v47  ;;  %v1766_v58 = vpack.c.bf16 %v342_v57, %v341_v55  ;;  %v1769_v61 = vpack.c.bf16 %v344_v60, %v343_v59  ;;  %v346_v63 = vld [vmem:[#allocation5 + $0x1b8] sm:$0xff]  ;;  %v347_v3 = vld [vmem:[#allocation5 + $0x1c0] sm:$0xff]  ;;  %v348_v4 = vld [vmem:[#allocation5 + $0x1c8] sm:$0xff] }
  0x45   :  { %1723 = vmatprep.subr.bf16.mxu1 %v2066_v0  ;;  %v1772_v2 = vpack.c.bf16 %v346_v63, %v345_v62  ;;  %v1775_v5 = vpack.c.bf16 %v348_v4, %v347_v3  ;;  %v349_v6 = vld [vmem:[#allocation5 + $0x1d0] sm:$0xff]  ;;  %v350_v7 = vld [vmem:[#allocation5 + $0x1d8] sm:$0xff]  ;;  %v2176_v12 = vld [vmem:[#allocation7] sm:$0xff] }
  0x46   :  { %1701 = vmatpush3.bf16.msra.mxu0 %v1700_v21  ;;  %v1778_v8 = vpack.c.bf16 %v350_v7, %v349_v6  ;;  %v82_v13 = vrot.slane %v2176_v12, %v81_v11  ;;  %v248_v15 = vld [vmem:[#allocation5 + $0x100] sm:$0xff]  ;;  %v249_v16 = vld [vmem:[#allocation5 + $0x108] sm:$0xff]  ;;  %v250_v21 = vld [vmem:[#allocation5 + $0x110] sm:$0xff] }
  0x47   :  { %1702 = vmatprep.subr.bf16.mxu0 %v2066_v0  ;;  %v1739_v20 = vpack.c.bf16 %v249_v16, %v248_v15  ;;  %v251_v22 = vld [vmem:[#allocation5 + $0x118] sm:$0xff]  ;;  %v252_v25 = vld [vmem:[#allocation5 + $0x120] sm:$0xff]  ;;  %v253_v26 = vld [vmem:[#allocation5 + $0x128] sm:$0xff] }
  0x48   :  { %1725 = vmatpush3.bf16.msra.mxu1 %v1724_v30  ;;  %v1742_v24 = vpack.c.bf16 %v251_v22, %v250_v21  ;;  %v254_v28 = vld [vmem:[#allocation5 + $0x130] sm:$0xff]  ;;  %v255_v29 = vld [vmem:[#allocation5 + $0x138] sm:$0xff]  ;;  %v256_v31 = vld [vmem:[#allocation5 + $0x140] sm:$0xff] }
  0x49   :  { %1726 = vmatprep.subr.bf16.mxu1 %v2066_v0  ;;  %v1748_v30 = vpack.c.bf16 %v255_v29, %v254_v28  ;;  %v257_v32 = vld [vmem:[#allocation5 + $0x148] sm:$0xff]  ;;  %v258_v34 = vld [vmem:[#allocation5 + $0x150] sm:$0xff]  ;;  %v259_v35 = vld [vmem:[#allocation5 + $0x158] sm:$0xff] }
  0x4a   :  { %1704 = vmatpush3.bf16.msra.mxu0 %v1703_v27  ;;  %v1745_v27 = vpack.c.bf16 %v253_v26, %v252_v25  ;;  %v260_v37 = vld [vmem:[#allocation5 + $0x160] sm:$0xff]  ;;  %v261_v38 = vld [vmem:[#allocation5 + $0x168] sm:$0xff]  ;;  %v262_v40 = vld [vmem:[#allocation5 + $0x170] sm:$0xff] }
  0x4b   :  { %1705 = vmatprep.subr.bf16.mxu0 %v2066_v0  ;;  %v263_v41 = vld [vmem:[#allocation5 + $0x178] sm:$0xff]  ;;  %v351_v44 = vld [vmem:[#allocation5 + $0x1e0] sm:$0xff]  ;;  %v352_v45 = vld [vmem:[#allocation5 + $0x1e8] sm:$0xff] }
  0x4c   :  { %1728 = vmatpush3.bf16.msra.mxu1 %v1727_v36  ;;  %v1754_v36 = vpack.c.bf16 %v259_v35, %v258_v34  ;;  %v353_v47 = vld [vmem:[#allocation5 + $0x1f0] sm:$0xff]  ;;  %v433_v54 = vld [vmem:[#allocation5 + $0x200] sm:$0xff]  ;;  %v434_v55 = vld [vmem:[#allocation5 + $0x208] sm:$0xff] }
  0x4d   :  { %1729 = vmatprep.subr.bf16.mxu1 %v2066_v0  ;;  %v435_v59 = vld [vmem:[#allocation5 + $0x210] sm:$0xff]  ;;  %v436_v60 = vld [vmem:[#allocation5 + $0x218] sm:$0xff]  ;;  %v437_v63 = vld [vmem:[#allocation5 + $0x220] sm:$0xff] }
  0x4e   :  { %1707 = vmatpush3.bf16.msra.mxu0 %v1706_v33  ;;  %v1751_v33 = vpack.c.bf16 %v257_v32, %v256_v31  ;;  %v1790_v62 = vpack.c.bf16 %v436_v60, %v435_v59  ;;  %v439_v4 = vld [vmem:[#allocation5 + $0x230] sm:$0xff]  ;;  %v441_v7 = vld [vmem:[#allocation5 + $0x240] sm:$0xff]  ;;  %v532_v26 = vld [vmem:[#allocation5 + $0x298] sm:$0xff] }
  0x4f   :  { %1708 = vmatprep.subr.bf16.mxu0 %v2066_v0  ;;  %v445_v16 = vld [vmem:[#allocation5 + $0x260] sm:$0xff]  ;;  %v534_v29 = vld [vmem:[#allocation5 + $0x2a8] sm:$0xff]  ;;  %v535_v31 = vld [vmem:[#allocation5 + $0x2b0] sm:$0xff] }
  0x50   :  { %1731 = vmatpush3.bf16.msra.mxu1 %v1730_v43  ;;  %v1760_v43 = vpack.c.bf16 %v263_v41, %v262_v40  ;;  %v529_v22 = vld [vmem:[#allocation5 + $0x280] sm:$0xff]  ;;  %v536_v32 = vld [vmem:[#allocation5 + $0x2b8] sm:$0xff]  ;;  %v538_v35 = vld [vmem:[#allocation5 + $0x2c8] sm:$0xff]  ;;  %v357_v40 = vsub.s32 2, %v2173_v10 }
  0x51   :  { %1732 = vmatprep.subr.bf16.mxu1 %v2066_v0  ;;  %v533_v28 = vld [vmem:[#allocation5 + $0x2a0] sm:$0xff]  ;;  %v626_v59 = vld [vmem:[#allocation5 + $0x318] sm:$0xff] }
  0x52   :  { %1710 = vmatpush3.bf16.msra.mxu0 %v1709_v39  ;;  %v1757_v39 = vpack.c.bf16 %v261_v38, %v260_v37  ;;  %v537_v34 = vld [vmem:[#allocation5 + $0x2c0] sm:$0xff]  ;;  %v539_v37 = vld [vmem:[#allocation5 + $0x2d0] sm:$0xff]  ;;  %v540_v38 = vld [vmem:[#allocation5 + $0x2d8] sm:$0xff]  ;;  %v358_v41 = vrot.slane %v2176_v12, %v357_v40 }
  0x53   :  { %1711 = vmatprep.subr.bf16.mxu0 %v2066_v0  ;;  %v727_v40 = vld [vmem:[#allocation5 + $0x3c0] sm:$0xff] }
  0x54   :  { %1734 = vmatpush3.bf16.msra.mxu1 %v1733_v48  ;;  %v354_v48 = vld [vmem:[#allocation5 + $0x1f8] sm:$0xff] }
  0x55   :  { %1735 = vmatprep.subr.bf16.mxu1 %v2066_v0 }
  0x56   :  { %1713 = vmatpush3.bf16.msra.mxu0 %v1712_v46  ;;  %v1781_v46 = vpack.c.bf16 %v352_v45, %v351_v44 }
  0x57   :  { %1762 = vmatprep.subr.bf16.mxu0 %v2066_v0 }
  0x58   :  { %1737 = vmatpush3.bf16.msra.mxu1 %v1736_v52 }
  0x59   :  { %1338 = vmatmul.mubr.f32.vlgmr.msra.gmra.mrb[0].mxu0 %v62_v49  ;;  %1738 = vmatprep.subr.bf16.mxu1 %v2066_v0  ;;  %v1784_v49 = vpack.c.bf16 %v354_v48, %v353_v47  ;;  %v541_v48 = vld [vmem:[#allocation5 + $0x2e0] sm:$0xff] }
  0x5a   :  { %1442 = vmatprep.mubr.msk.f32.mxu0 %vm2067_vm0, %v2068_v1  ;;  %1764 = vmatpush3.bf16.msra.mxu0 %v1763_v56 }
  0x5b   :  { %1765 = vmatprep.subr.bf16.mxu0 %v2066_v0 }
  0x5e   :  { %1767 = vmatpush3.bf16.msra.mxu0 %v1766_v58  ;;  %v1787_v58 = vpack.c.bf16 %v434_v55, %v433_v54  ;;  %v623_v54 = vld [vmem:[#allocation5 + $0x300] sm:$0xff]  ;;  %v624_v55 = vld [vmem:[#allocation5 + $0x308] sm:$0xff] }
  0x5f   :  { %1768 = vmatprep.subr.bf16.mxu0 %v2066_v0 }
  0x62   :  { %1770 = vmatpush3.bf16.msra.mxu0 %v1769_v61 }
  0x63   :  { %1771 = vmatprep.subr.bf16.mxu0 %v2066_v0 }
  0x66   :  { %1773 = vmatpush3.bf16.msra.mxu0 %v1772_v2  ;;  %v438_v2 = vld [vmem:[#allocation5 + $0x228] sm:$0xff] }
  0x67   :  { %1774 = vmatprep.subr.bf16.mxu0 %v2066_v0  ;;  %v1793_v3 = vpack.c.bf16 %v438_v2, %v437_v63  ;;  %v629_v2 = vld [vmem:[#allocation5 + $0x330] sm:$0xff] }
  0x6a   :  { %1776 = vmatpush3.bf16.msra.mxu0 %v1775_v5  ;;  %v440_v5 = vld [vmem:[#allocation5 + $0x238] sm:$0xff] }
  0x6b   :  { %1777 = vmatprep.subr.bf16.mxu0 %v2066_v0  ;;  %v1796_v6 = vpack.c.bf16 %v440_v5, %v439_v4  ;;  %v631_v5 = vld [vmem:[#allocation5 + $0x340] sm:$0xff] }
  0x6e   :  { %1779 = vmatpush3.bf16.msra.mxu0 %v1778_v8  ;;  %v442_v8 = vld [vmem:[#allocation5 + $0x248] sm:$0xff] }
  0x6f   :  { %1780 = vmatprep.subr.bf16.mxu0 %v2066_v0  ;;  %v1799_v9 = vpack.c.bf16 %v442_v8, %v441_v7  ;;  %v633_v8 = vld [vmem:[#allocation5 + $0x350] sm:$0xff] }
  0x72   :  { %1782 = vmatpush3.bf16.msra.mxu0 %v1781_v46 }
  0x73   :  { %1783 = vmatprep.subr.bf16.mxu0 %v2066_v0 }
  0x76   :  { %1785 = vmatpush3.bf16.msra.mxu0 %v1784_v49  ;;  %v542_v49 = vld [vmem:[#allocation5 + $0x2e8] sm:$0xff] }
  0x77   :  { %1786 = vmatprep.subr.bf16.mxu0 %v2066_v0 }
 0x12c   :  { %v149_v14 = vpop.f32.mrb[0].mxu0 }
 0x12d   :  { %v150_v17 = vadd.f32 %v149_v14, %v82_v13  ;;  %v1339_v18 = vpop.f32.mrb[1].mxu0  ;;  %v443_v13 = vld [vmem:[#allocation5 + $0x250] sm:$0xff]  ;;  %v444_v14 = vld [vmem:[#allocation5 + $0x258] sm:$0xff] }
 0x12e   :  { %v1802_v15 = vpack.c.bf16 %v444_v14, %v443_v13  ;;  %v635_v14 = vld [vmem:[#allocation5 + $0x360] sm:$0xff] }
 0x12f   :  { %v154_v19 = vmul.f32 0.2, %v150_v17  ;;  %vm153_vm2 = vcmp.ge.f32.partialorder %v150_v17, 0.0 }
 0x131   :  { %v155_v23 = vsel %vm153_vm2, %v150_v17, %v154_v19  ;;  %v446_v17 = vld [vmem:[#allocation5 + $0x268] sm:$0xff]  ;;  %v447_v19 = vld [vmem:[#allocation5 + $0x270] sm:$0xff] }
 0x132   :  { %1373 = vmatmul.mubr.f32.vlgmr.msra.gmra.mrb[0].mxu1 %v155_v23  ;;  %v1805_v18 = vpack.c.bf16 %v446_v17, %v445_v16  ;;  %v530_v23 = vld [vmem:[#allocation5 + $0x288] sm:$0xff]  ;;  %v451_v17 = vsub.s32 3, %v2173_v10 }
 0x133   :  { %1740 = vmatpush3.bf16.msra.mxu1 %v1739_v20  ;;  %1407 = vmatprep.mubr.msk.f32.mxu1 %vm2067_vm0, %v2068_v1  ;;  %v448_v20 = vld [vmem:[#allocation5 + $0x278] sm:$0xff]  ;;  %v1811_v25 = vpack.c.bf16 %v530_v23, %v529_v22 }
 0x134   :  { %1741 = vmatprep.subr.bf16.mxu1 %v2066_v0  ;;  %v1808_v21 = vpack.c.bf16 %v448_v20, %v447_v19 }
 0x137   :  { %1743 = vmatpush3.bf16.msra.mxu1 %v1742_v24  ;;  %v531_v24 = vld [vmem:[#allocation5 + $0x290] sm:$0xff] }
 0x138   :  { %1744 = vmatprep.subr.bf16.mxu1 %v2066_v0 }
 0x13b   :  { %1746 = vmatpush3.bf16.msra.mxu1 %v1745_v27  ;;  %v1814_v27 = vpack.c.bf16 %v532_v26, %v531_v24  ;;  %v637_v26 = vld [vmem:[#allocation5 + $0x370] sm:$0xff] }
 0x13c   :  { %1747 = vmatprep.subr.bf16.mxu1 %v2066_v0 }
 0x13f   :  { %1749 = vmatpush3.bf16.msra.mxu1 %v1748_v30  ;;  %v1817_v30 = vpack.c.bf16 %v534_v29, %v533_v28  ;;  %v719_v29 = vld [vmem:[#allocation5 + $0x380] sm:$0xff] }
 0x140   :  { %1750 = vmatprep.subr.bf16.mxu1 %v2066_v0 }
 0x143   :  { %1752 = vmatpush3.bf16.msra.mxu1 %v1751_v33  ;;  %v1820_v33 = vpack.c.bf16 %v536_v32, %v535_v31  ;;  %v722_v32 = vld [vmem:[#allocation5 + $0x398] sm:$0xff] }
 0x144   :  { %1753 = vmatprep.subr.bf16.mxu1 %v2066_v0 }
 0x147   :  { %1755 = vmatpush3.bf16.msra.mxu1 %v1754_v36  ;;  %v1823_v36 = vpack.c.bf16 %v538_v35, %v537_v34  ;;  %v723_v34 = vld [vmem:[#allocation5 + $0x3a0] sm:$0xff]  ;;  %v724_v35 = vld [vmem:[#allocation5 + $0x3a8] sm:$0xff] }
 0x148   :  { %1756 = vmatprep.subr.bf16.mxu1 %v2066_v0 }
 0x14b   :  { %1758 = vmatpush3.bf16.msra.mxu1 %v1757_v39  ;;  %v1826_v39 = vpack.c.bf16 %v540_v38, %v539_v37  ;;  %v725_v37 = vld [vmem:[#allocation5 + $0x3b0] sm:$0xff]  ;;  %v726_v38 = vld [vmem:[#allocation5 + $0x3b8] sm:$0xff] }
 0x14c   :  { %1759 = vmatprep.subr.bf16.mxu1 %v2066_v0 }
 0x14f   :  { %1761 = vmatpush3.bf16.msra.mxu1 %v1760_v43 }
 0x150   :  { %1810 = vmatprep.subr.bf16.mxu1 %v2066_v0 }
 0x152   :  { %1408 = vmatmul.mubr.f32.vlgmr.msra.gmra.mrb[0].mxu1 %v2154_v42  ;;  %v176_v42 = vrot.slane %v2176_v12, %v175_v50 }
 0x153   :  { %1512 = vmatprep.mubr.msk.f32.mxu1 %vm2067_vm0, %v2068_v1  ;;  %1812 = vmatpush3.bf16.msra.mxu1 %v1811_v25 }
 0x154   :  { %1813 = vmatprep.subr.bf16.mxu1 %v2066_v0 }
 0x157   :  { %1815 = vmatpush3.bf16.msra.mxu1 %v1814_v27  ;;  %v638_v27 = vld [vmem:[#allocation5 + $0x378] sm:$0xff] }
 0x158   :  { %1816 = vmatprep.subr.bf16.mxu1 %v2066_v0  ;;  %v1856_v28 = vpack.c.bf16 %v638_v27, %v637_v26 }
 0x15b   :  { %1818 = vmatpush3.bf16.msra.mxu1 %v1817_v30  ;;  %v721_v30 = vld [vmem:[#allocation5 + $0x390] sm:$0xff] }
 0x15c   :  { %1819 = vmatprep.subr.bf16.mxu1 %v2066_v0 }
 0x15f   :  { %1821 = vmatpush3.bf16.msra.mxu1 %v1820_v33  ;;  %v1862_v33 = vpack.c.bf16 %v722_v32, %v721_v30  ;;  %v827_v32 = vld [vmem:[#allocation5 + $0x470] sm:$0xff] }
 0x160   :  { %1822 = vmatprep.subr.bf16.mxu1 %v2066_v0 }
 0x163   :  { %1824 = vmatpush3.bf16.msra.mxu1 %v1823_v36  ;;  %v1865_v36 = vpack.c.bf16 %v724_v35, %v723_v34  ;;  %v909_v35 = vld [vmem:[#allocation5 + $0x480] sm:$0xff] }
 0x164   :  { %1825 = vmatprep.subr.bf16.mxu1 %v2066_v0 }
 0x167   :  { %1827 = vmatpush3.bf16.msra.mxu1 %v1826_v39  ;;  %v1868_v39 = vpack.c.bf16 %v726_v38, %v725_v37  ;;  %v912_v38 = vld [vmem:[#allocation5 + $0x498] sm:$0xff] }
 0x168   :  { %1828 = vmatprep.subr.bf16.mxu1 %v2066_v0 }
 0x225   :  { %v330_v51 = vpop.f32.mrb[0].mxu1 }
 0x226   :  { %v1954_v52 = vadd.f32 %v330_v51, %v176_v42  ;;  %v1409_v53 = vpop.f32.mrb[1].mxu1  ;;  %v1829_v42 = vpack.c.bf16 %v542_v49, %v541_v48  ;;  %v543_v51 = vld [vmem:[#allocation5 + $0x2f0] sm:$0xff] }
 0x228   :  { %v2200_v56 = vmul.f32 0.70710677, %v1954_v52  ;;  %1830 = vmatpush3.bf16.msra.mxu1 %v1829_v42  ;;  %v544_v52 = vld [vmem:[#allocation5 + $0x2f8] sm:$0xff] }
 0x229   :  { %1831 = vmatprep.subr.bf16.mxu1 %v2066_v0  ;;  %v1832_v53 = vpack.c.bf16 %v544_v52, %v543_v51 }
 0x22a   :  { %vm335_vm3 = vcmp.ge.f32.partialorder %v2200_v56, 0.0  ;;  %v336_v57 = vmul.f32 0.2, %v2200_v56 }
 0x22c   :  { %v337_v61 = vsel %vm335_vm3, %v2200_v56, %v336_v57  ;;  %1833 = vmatpush3.bf16.msra.mxu1 %v1832_v53  ;;  %v625_v57 = vld [vmem:[#allocation5 + $0x310] sm:$0xff] }
 0x22d   :  { %1443 = vmatmul.mubr.f32.vlgmr.msra.gmra.mrb[2].mxu0 %v337_v61  ;;  %1858 = vmatprep.subr.bf16.mxu1 %v2066_v0  ;;  %v1838_v60 = vpack.c.bf16 %v626_v59, %v625_v57  ;;  %v627_v61 = vld [vmem:[#allocation5 + $0x320] sm:$0xff]  ;;  %v734_v59 = vld [vmem:[#allocation5 + $0x3f8] sm:$0xff] }
 0x22e   :  { %1788 = vmatpush3.bf16.msra.mxu0 %v1787_v58  ;;  %1477 = vmatprep.mubr.msk.f32.mxu0 %vm2067_vm0, %v2068_v1  ;;  %v1835_v58 = vpack.c.bf16 %v624_v55, %v623_v54  ;;  %v731_v54 = vld [vmem:[#allocation5 + $0x3e0] sm:$0xff]  ;;  %v732_v55 = vld [vmem:[#allocation5 + $0x3e8] sm:$0xff] }
 0x22f   :  { %1789 = vmatprep.subr.bf16.mxu0 %v2066_v0  ;;  %v1877_v57 = vpack.c.bf16 %v732_v55, %v731_v54 }
 0x232   :  { %1791 = vmatpush3.bf16.msra.mxu0 %v1790_v62  ;;  %v628_v62 = vld [vmem:[#allocation5 + $0x328] sm:$0xff] }
 0x233   :  { %1792 = vmatprep.subr.bf16.mxu0 %v2066_v0  ;;  %v1841_v63 = vpack.c.bf16 %v628_v62, %v627_v61  ;;  %v813_v61 = vld [vmem:[#allocation5 + $0x400] sm:$0xff]  ;;  %v814_v62 = vld [vmem:[#allocation5 + $0x408] sm:$0xff] }
 0x236   :  { %1794 = vmatpush3.bf16.msra.mxu0 %v1793_v3  ;;  %v630_v3 = vld [vmem:[#allocation5 + $0x338] sm:$0xff] }
 0x237   :  { %1795 = vmatprep.subr.bf16.mxu0 %v2066_v0  ;;  %v1844_v4 = vpack.c.bf16 %v630_v3, %v629_v2  ;;  %v1883_v2 = vpack.c.bf16 %v814_v62, %v813_v61  ;;  %v816_v3 = vld [vmem:[#allocation5 + $0x418] sm:$0xff]  ;;  %v921_v61 = vld [vmem:[#allocation5 + $0x4e0] sm:$0xff]  ;;  %v922_v62 = vld [vmem:[#allocation5 + $0x4e8] sm:$0xff] }
 0x23a   :  { %1797 = vmatpush3.bf16.msra.mxu0 %v1796_v6  ;;  %v632_v6 = vld [vmem:[#allocation5 + $0x348] sm:$0xff] }
 0x23b   :  { %1798 = vmatprep.subr.bf16.mxu0 %v2066_v0  ;;  %v1847_v7 = vpack.c.bf16 %v632_v6, %v631_v5  ;;  %v817_v5 = vld [vmem:[#allocation5 + $0x420] sm:$0xff]  ;;  %v818_v6 = vld [vmem:[#allocation5 + $0x428] sm:$0xff] }
 0x23e   :  { %1800 = vmatpush3.bf16.msra.mxu0 %v1799_v9  ;;  %v634_v9 = vld [vmem:[#allocation5 + $0x358] sm:$0xff] }
 0x23f   :  { %1801 = vmatprep.subr.bf16.mxu0 %v2066_v0  ;;  %v1850_v13 = vpack.c.bf16 %v634_v9, %v633_v8  ;;  %v819_v8 = vld [vmem:[#allocation5 + $0x430] sm:$0xff]  ;;  %v820_v9 = vld [vmem:[#allocation5 + $0x438] sm:$0xff] }
 0x242   :  { %1803 = vmatpush3.bf16.msra.mxu0 %v1802_v15  ;;  %v636_v15 = vld [vmem:[#allocation5 + $0x368] sm:$0xff] }
 0x243   :  { %1804 = vmatprep.subr.bf16.mxu0 %v2066_v0  ;;  %v1853_v16 = vpack.c.bf16 %v636_v15, %v635_v14  ;;  %v821_v14 = vld [vmem:[#allocation5 + $0x440] sm:$0xff]  ;;  %v822_v15 = vld [vmem:[#allocation5 + $0x448] sm:$0xff] }
 0x246   :  { %1806 = vmatpush3.bf16.msra.mxu0 %v1805_v18  ;;  %v452_v18 = vrot.slane %v2176_v12, %v451_v17  ;;  %v823_v17 = vld [vmem:[#allocation5 + $0x450] sm:$0xff] }
 0x247   :  { %1807 = vmatprep.subr.bf16.mxu0 %v2066_v0 }
 0x24a   :  { %1809 = vmatpush3.bf16.msra.mxu0 %v1808_v21 }
 0x24b   :  { %1834 = vmatprep.subr.bf16.mxu0 %v2066_v0 }
 0x300   :  { %v425_v43 = vpop.f32.mrb[2].mxu0 }
 0x301   :  { %v426_v44 = vadd.f32 %v425_v43, %v358_v41  ;;  %v1444_v45 = vpop.f32.mrb[3].mxu0  ;;  %v728_v41 = vld [vmem:[#allocation5 + $0x3c8] sm:$0xff] }
 0x302   :  { %v1871_v43 = vpack.c.bf16 %v728_v41, %v727_v40  ;;  %v730_v45 = vld [vmem:[#allocation5 + $0x3d8] sm:$0xff]  ;;  %v913_v40 = vld [vmem:[#allocation5 + $0x4a0] sm:$0xff]  ;;  %v914_v41 = vld [vmem:[#allocation5 + $0x4a8] sm:$0xff] }
 0x303   :  { %vm429_vm4 = vcmp.ge.f32.partialorder %v426_v44, 0.0  ;;  %v430_v46 = vmul.f32 0.2, %v426_v44 }
 0x305   :  { %v431_v47 = vsel %vm429_vm4, %v426_v44, %v430_v46  ;;  %v729_v44 = vld [vmem:[#allocation5 + $0x3d0] sm:$0xff] }
 0x306   :  { %1478 = vmatmul.mubr.f32.vlgmr.msra.gmra.mrb[4].mxu0 %v431_v47  ;;  %v1874_v46 = vpack.c.bf16 %v730_v45, %v729_v44  ;;  %v547_v47 = vsub.s32 4, %v2173_v10  ;;  %v915_v44 = vld [vmem:[#allocation5 + $0x4b0] sm:$0xff]  ;;  %v916_v45 = vld [vmem:[#allocation5 + $0x4b8] sm:$0xff] }
 0x307   :  { %1547 = vmatprep.mubr.msk.f32.mxu0 %vm2067_vm0, %v2068_v1  ;;  %1836 = vmatpush3.bf16.msra.mxu0 %v1835_v58  ;;  %v733_v58 = vld [vmem:[#allocation5 + $0x3f0] sm:$0xff] }
 0x308   :  { %1837 = vmatprep.subr.bf16.mxu0 %v2066_v0  ;;  %v548_v48 = vrot.slane %v2176_v12, %v547_v47  ;;  %v917_v47 = vld [vmem:[#allocation5 + $0x4c0] sm:$0xff] }
 0x30b   :  { %1839 = vmatpush3.bf16.msra.mxu0 %v1838_v60  ;;  %v1880_v60 = vpack.c.bf16 %v734_v59, %v733_v58 }
 0x30c   :  { %1840 = vmatprep.subr.bf16.mxu0 %v2066_v0 }
 0x30f   :  { %1842 = vmatpush3.bf16.msra.mxu0 %v1841_v63  ;;  %v815_v63 = vld [vmem:[#allocation5 + $0x410] sm:$0xff] }
 0x310   :  { %1843 = vmatprep.subr.bf16.mxu0 %v2066_v0 }
 0x313   :  { %1845 = vmatpush3.bf16.msra.mxu0 %v1844_v4  ;;  %v1886_v4 = vpack.c.bf16 %v816_v3, %v815_v63  ;;  %v1925_v63 = vpack.c.bf16 %v922_v62, %v921_v61  ;;  %v924_v3 = vld [vmem:[#allocation5 + $0x4f8] sm:$0xff] }
 0x314   :  { %1846 = vmatprep.subr.bf16.mxu0 %v2066_v0 }
 0x317   :  { %1848 = vmatpush3.bf16.msra.mxu0 %v1847_v7  ;;  %v1889_v7 = vpack.c.bf16 %v818_v6, %v817_v5  ;;  %v1003_v5 = vld [vmem:[#allocation5 + $0x500] sm:$0xff]  ;;  %v1004_v6 = vld [vmem:[#allocation5 + $0x508] sm:$0xff] }
 0x318   :  { %1849 = vmatprep.subr.bf16.mxu0 %v2066_v0 }
 0x31b   :  { %1851 = vmatpush3.bf16.msra.mxu0 %v1850_v13  ;;  %v1892_v13 = vpack.c.bf16 %v820_v9, %v819_v8  ;;  %v1931_v8 = vpack.c.bf16 %v1004_v6, %v1003_v5  ;;  %v1006_v9 = vld [vmem:[#allocation5 + $0x518] sm:$0xff] }
 0x31c   :  { %1852 = vmatprep.subr.bf16.mxu0 %v2066_v0 }
 0x31f   :  { %1854 = vmatpush3.bf16.msra.mxu0 %v1853_v16  ;;  %v1895_v16 = vpack.c.bf16 %v822_v15, %v821_v14  ;;  %v1008_v14 = vld [vmem:[#allocation5 + $0x528] sm:$0xff] }
 0x320   :  { %1855 = vmatprep.subr.bf16.mxu0 %v2066_v0 }
 0x323   :  { %1857 = vmatpush3.bf16.msra.mxu0 %v1856_v28 }
 0x324   :  { %1882 = vmatprep.subr.bf16.mxu0 %v2066_v0 }
 0x3d9   :  { %v519_v19 = vpop.f32.mrb[4].mxu0 }
 0x3da   :  { %v520_v20 = vadd.f32 %v519_v19, %v452_v18  ;;  %v1479_v21 = vpop.f32.mrb[5].mxu0  ;;  %v824_v18 = vld [vmem:[#allocation5 + $0x458] sm:$0xff] }
 0x3db   :  { %v1898_v19 = vpack.c.bf16 %v824_v18, %v823_v17  ;;  %v826_v21 = vld [vmem:[#allocation5 + $0x468] sm:$0xff]  ;;  %v1010_v17 = vld [vmem:[#allocation5 + $0x538] sm:$0xff] }
 0x3dc   :  { %v523_v22 = vadd.f32 %v520_v20, %v2200_v56  ;;  %v720_v56 = vld [vmem:[#allocation5 + $0x388] sm:$0xff]  ;;  %v825_v20 = vld [vmem:[#allocation5 + $0x460] sm:$0xff] }
 0x3dd   :  { %v1859_v31 = vpack.c.bf16 %v720_v56, %v719_v29 }
 0x3de   :  { %v2237_v23 = vmul.f32 0.70710677, %v523_v22  ;;  %v1901_v22 = vpack.c.bf16 %v826_v21, %v825_v20  ;;  %v1012_v20 = vld [vmem:[#allocation5 + $0x548] sm:$0xff] }
 0x3e0   :  { %vm525_vm5 = vcmp.ge.f32.partialorder %v2237_v23, 0.0  ;;  %v526_v24 = vmul.f32 0.2, %v2237_v23 }
 0x3e2   :  { %v527_v25 = vsel %vm525_vm5, %v2237_v23, %v526_v24  ;;  %v641_v24 = vsub.s32 5, %v2173_v10 }
 0x3e3   :  { %1513 = vmatmul.mubr.f32.vlgmr.msra.gmra.mrb[2].mxu1 %v527_v25 }
 0x3e4   :  { %1582 = vmatprep.mubr.msk.f32.mxu1 %vm2067_vm0, %v2068_v1  ;;  %1860 = vmatpush3.bf16.msra.mxu1 %v1859_v31  ;;  %v642_v25 = vrot.slane %v2176_v12, %v641_v24  ;;  %v1014_v24 = vld [vmem:[#allocation5 + $0x558] sm:$0xff] }
 0x3e5   :  { %1861 = vmatprep.subr.bf16.mxu1 %v2066_v0 }
 0x3e8   :  { %1863 = vmatpush3.bf16.msra.mxu1 %v1862_v33  ;;  %v828_v33 = vld [vmem:[#allocation5 + $0x478] sm:$0xff] }
 0x3e9   :  { %1864 = vmatprep.subr.bf16.mxu1 %v2066_v0  ;;  %v1904_v34 = vpack.c.bf16 %v828_v33, %v827_v32 }
 0x3ec   :  { %1866 = vmatpush3.bf16.msra.mxu1 %v1865_v36  ;;  %v911_v36 = vld [vmem:[#allocation5 + $0x490] sm:$0xff] }
 0x3ed   :  { %1867 = vmatprep.subr.bf16.mxu1 %v2066_v0 }
 0x3f0   :  { %1869 = vmatpush3.bf16.msra.mxu1 %v1868_v39  ;;  %v1910_v39 = vpack.c.bf16 %v912_v38, %v911_v36  ;;  %v1018_v38 = vld [vmem:[#allocation5 + $0x578] sm:$0xff] }
 0x3f1   :  { %1870 = vmatprep.subr.bf16.mxu1 %v2066_v0 }
 0x3f4   :  { %1872 = vmatpush3.bf16.msra.mxu1 %v1871_v43  ;;  %v1913_v43 = vpack.c.bf16 %v914_v41, %v913_v40  ;;  %v58_v40 = vld [vmem:[#allocation7 + $0x8] sm:$0xff] }
 0x3f5   :  { %1873 = vmatprep.subr.bf16.mxu1 %v2066_v0 }
 0x3f8   :  { %1875 = vmatpush3.bf16.msra.mxu1 %v1874_v46  ;;  %v1916_v46 = vpack.c.bf16 %v916_v45, %v915_v44 }
 0x3f9   :  { %1876 = vmatprep.subr.bf16.mxu1 %v2066_v0 }
 0x3fc   :  { %1878 = vmatpush3.bf16.msra.mxu1 %v1877_v57 }
 0x3fd   :  { %1879 = vmatprep.subr.bf16.mxu1 %v2066_v0 }
 0x400   :  { %1881 = vmatpush3.bf16.msra.mxu1 %v1880_v60 }
 0x401   :  { %1906 = vmatprep.subr.bf16.mxu1 %v2066_v0 }
 0x4b6   :  { %v615_v49 = vpop.f32.mrb[2].mxu1 }
 0x4b7   :  { %v616_v42 = vadd.f32 %v615_v49, %v548_v48  ;;  %v1514_v51 = vpop.f32.mrb[3].mxu1  ;;  %v918_v48 = vld [vmem:[#allocation5 + $0x4c8] sm:$0xff] }
 0x4b8   :  { %v1919_v49 = vpack.c.bf16 %v918_v48, %v917_v47  ;;  %v920_v51 = vld [vmem:[#allocation5 + $0x4d8] sm:$0xff] }
 0x4b9   :  { %vm619_vm6 = vcmp.ge.f32.partialorder %v616_v42, 0.0  ;;  %v620_v52 = vmul.f32 0.2, %v616_v42 }
 0x4bb   :  { %v621_v53 = vsel %vm619_vm6, %v616_v42, %v620_v52  ;;  %v919_v42 = vld [vmem:[#allocation5 + $0x4d0] sm:$0xff] }
 0x4bc   :  { %1548 = vmatmul.mubr.f32.vlgmr.msra.gmra.mrb[6].mxu0 %v621_v53  ;;  %v1922_v52 = vpack.c.bf16 %v920_v51, %v919_v42  ;;  %v737_v53 = vsub.s32 6, %v2173_v10 }
 0x4bd   :  { %1617 = vmatprep.mubr.msk.f32.mxu0 %vm2067_vm0, %v2068_v1  ;;  %1884 = vmatpush3.bf16.msra.mxu0 %v1883_v2  ;;  %v923_v2 = vld [vmem:[#allocation5 + $0x4f0] sm:$0xff] }
 0x4be   :  { %1885 = vmatprep.subr.bf16.mxu0 %v2066_v0  ;;  %v738_v54 = vrot.slane %v2176_v12, %v737_v53 }
 0x4c1   :  { %1887 = vmatpush3.bf16.msra.mxu0 %v1886_v4  ;;  %v1928_v4 = vpack.c.bf16 %v924_v3, %v923_v2 }
 0x4c2   :  { %1888 = vmatprep.subr.bf16.mxu0 %v2066_v0 }
 0x4c5   :  { %1890 = vmatpush3.bf16.msra.mxu0 %v1889_v7  ;;  %v1005_v7 = vld [vmem:[#allocation5 + $0x510] sm:$0xff] }
 0x4c6   :  { %1891 = vmatprep.subr.bf16.mxu0 %v2066_v0 }
 0x4c9   :  { %1893 = vmatpush3.bf16.msra.mxu0 %v1892_v13  ;;  %v1934_v13 = vpack.c.bf16 %v1006_v9, %v1005_v7 }
 0x4ca   :  { %1894 = vmatprep.subr.bf16.mxu0 %v2066_v0 }
 0x4cd   :  { %1896 = vmatpush3.bf16.msra.mxu0 %v1895_v16  ;;  %v1009_v16 = vld [vmem:[#allocation5 + $0x530] sm:$0xff] }
 0x4ce   :  { %1897 = vmatprep.subr.bf16.mxu0 %v2066_v0  ;;  %v1940_v18 = vpack.c.bf16 %v1010_v17, %v1009_v16 }
 0x4d1   :  { %1899 = vmatpush3.bf16.msra.mxu0 %v1898_v19  ;;  %v1011_v19 = vld [vmem:[#allocation5 + $0x540] sm:$0xff] }
 0x4d2   :  { %1900 = vmatprep.subr.bf16.mxu0 %v2066_v0  ;;  %v1943_v21 = vpack.c.bf16 %v1012_v20, %v1011_v19 }
 0x4d5   :  { %1902 = vmatpush3.bf16.msra.mxu0 %v1901_v22  ;;  %v1013_v22 = vld [vmem:[#allocation5 + $0x550] sm:$0xff] }
 0x4d6   :  { %1903 = vmatprep.subr.bf16.mxu0 %v2066_v0 }
 0x4d9   :  { %1905 = vmatpush3.bf16.msra.mxu0 %v1904_v34 }
 0x4da   :  { %1930 = vmatprep.subr.bf16.mxu0 %v2066_v0 }
 0x58f   :  { %v709_v26 = vpop.f32.mrb[6].mxu0 }
 0x590   :  { %v710_v27 = vadd.f32 %v709_v26, %v642_v25  ;;  %v1549_v28 = vpop.f32.mrb[7].mxu0  ;;  %v1946_v25 = vpack.c.bf16 %v1014_v24, %v1013_v22  ;;  %v1015_v26 = vld [vmem:[#allocation5 + $0x560] sm:$0xff] }
 0x592   :  { %v713_v29 = vadd.f32 %v710_v27, %v2237_v23  ;;  %v910_v23 = vld [vmem:[#allocation5 + $0x488] sm:$0xff] }
 0x593   :  { %v1907_v37 = vpack.c.bf16 %v910_v23, %v909_v35  ;;  %v1016_v27 = vld [vmem:[#allocation5 + $0x568] sm:$0xff] }
 0x594   :  { %v2267_v56 = vmul.f32 0.70710677, %v713_v29  ;;  %v1949_v28 = vpack.c.bf16 %v1016_v27, %v1015_v26  ;;  %v831_v29 = vsub.s32 7, %v2173_v10 }
 0x596   :  { %vm715_vm7 = vcmp.ge.f32.partialorder %v2267_v56, 0.0  ;;  %v716_v30 = vmul.f32 0.2, %v2267_v56 }
 0x598   :  { %v717_v31 = vsel %vm715_vm7, %v2267_v56, %v716_v30  ;;  %v832_v30 = vrot.slane %v2176_v12, %v831_v29 }
 0x599   :  { %1583 = vmatmul.mubr.f32.vlgmr.msra.gmra.mrb[4].mxu1 %v717_v31 }
 0x59a   :  { %1652 = vmatprep.mubr.msk.f32.mxu1 %vm2067_vm0, %v2068_v1  ;;  %1908 = vmatpush3.bf16.msra.mxu1 %v1907_v37  ;;  %v1017_v37 = vld [vmem:[#allocation5 + $0x570] sm:$0xff] }
 0x59b   :  { %1909 = vmatprep.subr.bf16.mxu1 %v2066_v0 }
 0x59e   :  { %1911 = vmatpush3.bf16.msra.mxu1 %v1910_v39  ;;  %v1952_v39 = vpack.c.bf16 %v1018_v38, %v1017_v37 }
 0x59f   :  { %1912 = vmatprep.subr.bf16.mxu1 %v2066_v0 }
 0x5a2   :  { %1914 = vmatpush3.bf16.msra.mxu1 %v1913_v43 }
 0x5a3   :  { %1915 = vmatprep.subr.bf16.mxu1 %v2066_v0 }
 0x5a6   :  { %1917 = vmatpush3.bf16.msra.mxu1 %v1916_v46 }
 0x5a7   :  { %1918 = vmatprep.subr.bf16.mxu1 %v2066_v0 }
 0x5aa   :  { %1920 = vmatpush3.bf16.msra.mxu1 %v1919_v49  ;;  %v1093_v49 = vld [vmem:[%s2318_s3] sm:$0x3] }
 0x5ab   :  { %1921 = vmatprep.subr.bf16.mxu1 %v2066_v0  ;;  %vm1094_vm11 = vcmp.eq.s32.totalorder %v1093_v49, 1 }
 0x5ae   :  { %1923 = vmatpush3.bf16.msra.mxu1 %v1922_v52 }
 0x5af   :  { %1924 = vmatprep.subr.bf16.mxu1 %v2066_v0 }
 0x5b2   :  { %1926 = vmatpush3.bf16.msra.mxu1 %v1925_v63 }
 0x5b3   :  { %1927 = vmatprep.subr.bf16.mxu1 %v2066_v0 }
 0x5b6   :  { %1929 = vmatpush3.bf16.msra.mxu1 %v1928_v4 }
 0x66c   :  { %v805_v55 = vpop.f32.mrb[4].mxu1 }
 0x66d   :  { %v806_v57 = vadd.f32 %v805_v55, %v738_v54  ;;  %v1584_v58 = vpop.f32.mrb[5].mxu1 }
 0x66f   :  { %vm809_vm8 = vcmp.ge.f32.partialorder %v806_v57, 0.0  ;;  %v810_v59 = vmul.f32 0.2, %v806_v57 }
 0x671   :  { %v811_v60 = vsel %vm809_vm8, %v806_v57, %v810_v59 }
 0x672   :  { %1618 = vmatmul.mubr.f32.vlgmr.msra.gmra.mrb[8].mxu0 %v811_v60 }
 0x673   :  { %1687 = vmatprep.mubr.msk.f32.mxu0 %vm2067_vm0, %v2068_v1  ;;  %1932 = vmatpush3.bf16.msra.mxu0 %v1931_v8  ;;  %v1007_v1 = vld [vmem:[#allocation5 + $0x520] sm:$0xff] }
 0x674   :  { %1933 = vmatprep.subr.bf16.mxu0 %v2066_v0  ;;  %v1937_v15 = vpack.c.bf16 %v1008_v14, %v1007_v1 }
 0x677   :  { %1935 = vmatpush3.bf16.msra.mxu0 %v1934_v13 }
 0x678   :  { %1936 = vmatprep.subr.bf16.mxu0 %v2066_v0 }
 0x67b   :  { %1938 = vmatpush3.bf16.msra.mxu0 %v1937_v15 }
 0x67c   :  { %1939 = vmatprep.subr.bf16.mxu0 %v2066_v0 }
 0x67f   :  { %1941 = vmatpush3.bf16.msra.mxu0 %v1940_v18 }
 0x680   :  { %1942 = vmatprep.subr.bf16.mxu0 %v2066_v0 }
 0x683   :  { %1944 = vmatpush3.bf16.msra.mxu0 %v1943_v21 }
 0x684   :  { %1945 = vmatprep.subr.bf16.mxu0 %v2066_v0 }
 0x687   :  { %1947 = vmatpush3.bf16.msra.mxu0 %v1946_v25 }
 0x688   :  { %1948 = vmatprep.subr.bf16.mxu0 %v2066_v0 }
 0x68b   :  { %1950 = vmatpush3.bf16.msra.mxu0 %v1949_v28 }
 0x68c   :  { %1951 = vmatprep.subr.bf16.mxu0 %v2066_v0  ;;  %v928_v0 = vrot.slane %v58_v40, %v81_v11 }
 0x68f   :  { %1953 = vmatpush3.bf16.msra.mxu0 %v1952_v39 }
 0x745   :  { %v899_v31 = vpop.f32.mrb[8].mxu0 }
 0x746   :  { %v900_v32 = vadd.f32 %v899_v31, %v832_v30  ;;  %v1619_v33 = vpop.f32.mrb[9].mxu0 }
 0x748   :  { %v903_v34 = vadd.f32 %v900_v32, %v2267_v56  ;;  %v1022_v56 = vrot.slane %v58_v40, %v175_v50 }
 0x74a   :  { %v904_v35 = vmul.f32 0.70710677, %v903_v34 }
 0x74c   :  { %v906_v23 = vmul.f32 0.2, %v904_v35  ;;  %vm905_vm9 = vcmp.ge.f32.partialorder %v904_v35, 0.0 }
 0x74e   :  { %v907_v36 = vsel %vm905_vm9, %v904_v35, %v906_v23 }
 0x74f   :  { %1653 = vmatmul.mubr.f32.vlgmr.msra.gmra.mrb[6].mxu1 %v907_v36 }
 0x822   :  { %v995_v41 = vpop.f32.mrb[6].mxu1 }
 0x823   :  { %v996_v12 = vadd.f32 %v995_v41, %v928_v0  ;;  %v1654_v43 = vpop.f32.mrb[7].mxu1 }
 0x825   :  { %vm999_vm10 = vcmp.ge.f32.partialorder %v996_v12, 0.0  ;;  %v1000_v44 = vmul.f32 0.2, %v996_v12 }
 0x827   :  { %v1001_v45 = vsel %vm999_vm10, %v996_v12, %v1000_v44 }
 0x828   :  { %1688 = vmatmul.mubr.f32.vlgmr.msra.gmra.mrb[10].mxu0 %v1001_v45 }
 0x8fb   :  { %v1089_v46 = vpop.f32.mrb[10].mxu0 }
 0x8fc   :  { %v1090_v47 = vadd.f32 %v1089_v46, %v1022_v56  ;;  %v1689_v48 = vpop.f32.mrb[11].mxu0 }
 0x8fe   :  { %1096 = vrot.lane.b32.xlu0 %v1090_v47, %s2069_s2 }
 0x970   :  { %v1097_v11 = vpop.permute.xlu0 %1096 }
 0x971   :  { %v1099_v42 = vsel %vm1094_vm11, %v1097_v11, %v1090_v47 }
 0x972   :  { %1101 = vst.msk [vmem:[#allocation8] sm:$0x3] %vm1100_vm12, %v1099_v42 }
 0x973   :  { %2044 = shalt.err (!%p2041_p0)
}
 0x974   :  { %s2045_s6 = scalar_lea.hbm %s2319_s4, 32 }
 0x975   :  { %p2046_p1 = scmp.ne.s32.totalorder %s2319_s4, %s2045_s6  ;;  %p2049_p2 = scmp.lt.u32.totalorder %s2045_s6, %s2319_s4 }
 0x977   :  { %p2051_p3 = pnand %p2049_p2, %p2046_p1 }
 0x979   :  { %2054 = shalt.err (!%p2051_p3)
}
 0x97a   :  { %1111 = dma.vmem_to_hbm [thread:$0]  %s1109_s28, 32, %s2319_s4, [#allocation4]  }
 0x97b   :  { %2059 = dma.done.wait [#allocation4], 32  }
 0x97c   :  { %2060 = vsyncadd [#allocation4], 4294967264 }
 0x97d   :  { %1115 = vsyncpa [#allocation3], 1 }
 0x97e   :  { %1116 = vsyncpa [#allocation6], 1 }
 0x97f   :  { %1117 = vsyncpa [#allocation4], 1 }

</bundles_post_ra>
